<compile_context>
chip_gen: v6e
topology: v6e:2x2x1
jax: 0.10.0
libtpu: 0.0.40
codegen_flags: <defaults>
</compile_context>

<pallas_src>
import functools

import jax
import jax.numpy as jnp
from jax import lax
from jax.experimental import pallas as pl
from jax.experimental.pallas import tpu as pltpu


def _dp_lookup_kernel(tex_ref, flow_ref, out_ref, *, c, h_pad, h_in, w_in):
    """One (batch, P-tile) step.

    tex_ref:  (1, C*Hpad, Win)  zero-row-padded texture, resident across P tiles
    flow_ref: (1, 3, TP)        [mask, grid_x, grid_y] per output pixel
    out_ref:  (1, C, TP)
    """
    tex = tex_ref[0]                                      # (C*Hpad, Win)
    flow = flow_ref[0]                                    # (3, TP)
    tp = flow.shape[-1]

    # flow = where(mask == 1, grid, 5.0)  (flowzero = 5, same sentinel as the
    # PyTorch module; after align_corners un-normalization it lands > 1 texel
    # out of range, so every hat weight is 0 -> output 0, exactly as
    # grid_sample produces for the masked grid with zeros padding).
    mask = flow[0:1, :] == 1.0                            # (1, TP)
    gx = jnp.where(mask, flow[1:2, :], 5.0)               # (1, TP) normalized x
    gy = jnp.where(mask, flow[2:3, :], 5.0)               # (1, TP) normalized y

    # align_corners=True un-normalization: [-1, 1] -> [0, dim-1]
    x_un = (gx + 1.0) * (0.5 * float(w_in - 1))           # (1, TP)
    y_un = (gy + 1.0) * (0.5 * float(h_in - 1))           # (1, TP)

    # Separable bilinear hat weights.  (int32 iota + convert is negligible now
    # that the (T, TP) outer product is gone.)
    w_idx = lax.broadcasted_iota(jnp.int32, (w_in, tp), 0).astype(jnp.float32)
    h_idx = lax.broadcasted_iota(jnp.int32, (h_pad, tp), 0).astype(jnp.float32)
    wx = jnp.maximum(0.0, 1.0 - jnp.abs(x_un - w_idx))    # (Win, TP)
    wy = jnp.maximum(0.0, 1.0 - jnp.abs(y_un - h_idx))    # (Hpad, TP)

    # Stage 1 (MXU): contract the texture over Win.
    #   (C*Hpad, Win) @ (Win, TP) -> (C*Hpad, TP), f32 accumulate.
    tmp = jnp.dot(tex, wx, preferred_element_type=jnp.float32)

    # Stage 2 (VPU): weight by the row hats and reduce over Hin.
    # Hpad % 8 == 0 so the (C*Hpad, TP) -> (C, Hpad, TP) split is
    # layout-preserving (no cross-sublane relayout).  Padded texture rows are
    # zero, so any nonzero wy beyond h_in contributes nothing.
    tmp = tmp.reshape(c, h_pad, tp)
    out_ref[0] = jnp.sum(tmp * wy[None, :, :], axis=1)    # (C, TP)


def _vmem_caps():
    """Generation-aware (in-kernel temp budget, vmem_limit cap) in bytes."""
    try:
        cap = int(getattr(pltpu.get_tpu_info(), "vmem_capacity_bytes", 64 << 20))
    except Exception:  # be conservative (assume v7x) if the query fails
        cap = 64 << 20
    if cap <= (64 << 20):            # v7x: 64 MiB physical VMEM per TensorCore
        return 11 << 20, 38 << 20
    return 22 << 20, 64 << 20        # v5e / v6e: 128 MiB physical


def _choose_tile_p(c, h_pad, w_in, p, n, temp_budget):
    """Pick the P tile size (multiple of 128).

    Bounds the live in-kernel f32 temporaries -- wx (Win,TP), wy (Hpad,TP),
    the stage-1 result (C*Hpad,TP) plus ~2x that for the stage-2 broadcast /
    product -- plus the double-buffered flow/out pipeline tiles.
    """
    bytes_per_col = 4 * (w_in + h_pad + 3 * c * h_pad + 2 * 2 * (3 + c))
    max_tp = max(128, (temp_budget // bytes_per_col) // 128 * 128)
    p128 = pl.cdiv(p, 128) * 128
    tp = max(128, min(16384, max_tp, p128) // 128 * 128)
    # Keep >= 2 total grid steps when possible so the "parallel" axes can be
    # sharded across v7x's two TensorCores (no-op on 1-TC v5e/v6e).
    if n * pl.cdiv(p128, tp) < 2 and p128 >= 256:
        tp = max(128, (p128 // 2) // 128 * 128)
    return tp


def dp_lookup_renderer_normal(normal_tex, normal_flow_b):
    """Pallas equivalent of DPLookupRendererNormal.forward (bilinear).

    normal_tex:    (N, C, Hin, Win)   float32
    normal_flow_b: (N, 3, Hout, Wout) float32 (channel 0 = mask, 1:3 = grid)
    returns:       (N, C, Hout, Wout) float32
    """
    n, c, h_in, w_in = normal_tex.shape
    n2, three, h_out, w_out = normal_flow_b.shape
    assert n == n2 and three == 3
    # The flowzero=5 sentinel relies on the align_corners scale pushing masked
    # pixels > 1 texel out of range; degenerate 1-texel dims would break that.
    assert h_in >= 2 and w_in >= 2, "texture must be at least 2x2"

    p = h_out * w_out
    h_pad = pl.cdiv(h_in, 8) * 8   # layout-preserving (C,Hpad,TP) split in-kernel

    temp_budget, vmem_cap = _vmem_caps()
    tp = _choose_tile_p(c, h_pad, w_in, p, n, temp_budget)
    p_pad = pl.cdiv(p, tp) * tp
    num_p_tiles = p_pad // tp

    tex_prep = normal_tex.astype(jnp.float32)
    if h_pad != h_in:
        # Zero rows: their stage-1 output is 0, so they contribute nothing.
        tex_prep = jnp.pad(tex_prep, ((0, 0), (0, 0), (0, h_pad - h_in), (0, 0)))
    tex_flat = tex_prep.reshape(n, c * h_pad, w_in)

    flow_flat = normal_flow_b.reshape(n, 3, p).astype(jnp.float32)
    if p_pad != p:
        # Padded pixels: mask 0 -> sentinel -> zero weights -> zero output.
        flow_flat = jnp.pad(flow_flat, ((0, 0), (0, 0), (0, p_pad - p)))

    est_bytes = (
        2 * c * h_pad * w_in * 4                      # resident tex (double-buffered)
        + 2 * 2 * (3 + c) * tp * 4                    # flow/out pipeline tiles
        + (w_in + h_pad + 3 * c * h_pad) * tp * 4     # in-kernel temporaries
        + (2 << 20)                                   # Mosaic internal scratch slack
    )
    vmem_limit = int(min(vmem_cap, max(est_bytes, 16 << 20)))

    cost = pl.CostEstimate(
        flops=2 * n * c * h_pad * w_in * p_pad + 2 * n * c * h_pad * p_pad,
        transcendentals=0,
        bytes_accessed=4 * (n * c * h_pad * w_in + n * 3 * p_pad + n * c * p_pad),
    )

    kernel = functools.partial(
        _dp_lookup_kernel, c=c, h_pad=h_pad, h_in=h_in, w_in=w_in)

    out_flat = pl.pallas_call(
        kernel,
        out_shape=jax.ShapeDtypeStruct((n, c, p_pad), jnp.float32),
        grid_spec=pltpu.PrefetchScalarGridSpec(
            num_scalar_prefetch=0,
            grid=(n, num_p_tiles),
            in_specs=[
                # Texture block constant along the P-tile axis -> stays resident.
                pl.BlockSpec((1, c * h_pad, w_in), lambda b, j: (b, 0, 0)),
                pl.BlockSpec((1, 3, tp), lambda b, j: (b, 0, j)),
            ],
            out_specs=pl.BlockSpec((1, c, tp), lambda b, j: (b, 0, j)),
        ),
        compiler_params=pltpu.CompilerParams(
            dimension_semantics=("parallel", "parallel"),
            vmem_limit_bytes=vmem_limit,
        ),
        cost_estimate=cost,
    )(tex_flat, flow_flat)

    return out_flat[:, :, :p].reshape(n, c, h_out, w_out)


# ----------------------- pure-JAX reference (for checking) -----------------
def _grid_sample_bilinear_ref(tex, grid):
    # tex: (N, C, Hin, Win), grid: (N, Ho, Wo, 2), align_corners=True, zeros pad
    n, c, h_in, w_in = tex.shape
    gx, gy = grid[..., 0], grid[..., 1]
    x = (gx + 1.0) * 0.5 * (w_in - 1)
    y = (gy + 1.0) * 0.5 * (h_in - 1)
    x0 = jnp.floor(x); x1 = x0 + 1.0
    y0 = jnp.floor(y); y1 = y0 + 1.0
    wx1 = x - x0; wx0 = 1.0 - wx1
    wy1 = y - y0; wy0 = 1.0 - wy1
    tex_flat = tex.reshape(n, c, h_in * w_in)

    def gather(xi, yi):
        valid = (xi >= 0) & (xi <= w_in - 1) & (yi >= 0) & (yi <= h_in - 1)
        xc = jnp.clip(xi, 0, w_in - 1).astype(jnp.int32)
        yc = jnp.clip(yi, 0, h_in - 1).astype(jnp.int32)
        flat = yc * w_in + xc                              # (N, Ho, Wo)
        vals = jax.vmap(lambda tf, fi: tf[:, fi.reshape(-1)])(
            tex_flat, flat).reshape(n, c, *flat.shape[1:])
        return vals * valid[:, None].astype(tex.dtype)

    return (gather(x0, y0) * (wx0 * wy0)[:, None]
            + gather(x1, y0) * (wx1 * wy0)[:, None]
            + gather(x0, y1) * (wx0 * wy1)[:, None]
            + gather(x1, y1) * (wx1 * wy1)[:, None])


def dp_lookup_ref(normal_tex, normal_flow_b):
    nf = jnp.transpose(normal_flow_b, (0, 2, 3, 1))        # NHWC
    mask = nf[..., 0:1] == 1.0
    flow = jnp.where(mask, nf[..., 1:], 5.0)
    return _grid_sample_bilinear_ref(normal_tex, flow)


if __name__ == "__main__":
    key = jax.random.PRNGKey(0)
    k1, k2, k3 = jax.random.split(key, 3)

    N, C, HIN, WIN = 2, 3, 16, 16
    HOUT, WOUT = 16, 16

    normal_tex = jax.random.normal(k1, (N, C, HIN, WIN), dtype=jnp.float32)
    # channel 0: mask that is exactly 1.0 where valid, 0.0 elsewhere
    mask = (jax.random.uniform(k2, (N, 1, HOUT, WOUT)) > 0.4).astype(jnp.float32)
    # channels 1:3: grid coords, slightly past [-1, 1] to exercise zeros padding
    coords = jax.random.uniform(k3, (N, 2, HOUT, WOUT),
                                minval=-1.1, maxval=1.1).astype(jnp.float32)
    normal_flow_b = jnp.concatenate([mask, coords], axis=1)   # (N, 3, H, W)

    out = dp_lookup_renderer_normal(normal_tex, normal_flow_b)
    out = jax.block_until_ready(out)

    ref = jax.block_until_ready(dp_lookup_ref(normal_tex, normal_flow_b))
    assert out.shape == (N, C, HOUT, WOUT)
    assert jnp.allclose(out, ref, atol=1e-4, rtol=1e-4), (
        float(jnp.max(jnp.abs(out - ref))))

    print("KERNEL_OK")
</pallas_src>

<mosaic_0001>
module attributes {stable_mosaic.version = 11 : i64} {
  func.func @_dp_lookup_kernel(%arg0: i32, %arg1: i32, %arg2: memref<1x48x16xf32, #tpu.memory_space<vmem>>, %arg3: memref<1x3x256xf32, #tpu.memory_space<vmem>>, %arg4: memref<1x3x256xf32, #tpu.memory_space<vmem>>) attributes {dimension_semantics = [#tpu.dimension_semantics<parallel>, #tpu.dimension_semantics<parallel>], iteration_bounds = array<i64: 2, 1>, scalar_prefetch = 0 : i64, scratch_operands = 0 : i64, tpu.core_type = #tpu.core_type<tc>, window_params = [{transform_indices = @transform_0, window_bounds = array<i64: 1, 48, 16>}, {transform_indices = @transform_1, window_bounds = array<i64: 1, 3, 256>}, {transform_indices = @transform_2, window_bounds = array<i64: 1, 3, 256>}]} {
    %c0 = arith.constant 0 : index
    %c0_0 = arith.constant 0 : index
    %c0_1 = arith.constant 0 : index
    %0 = vector.load %arg2[%c0, %c0_0, %c0_1] : memref<1x48x16xf32, #tpu.memory_space<vmem>>, vector<1x48x16xf32>
    %1 = vector.shape_cast %0 : vector<1x48x16xf32> to vector<48x16xf32>
    %c0_2 = arith.constant 0 : index
    %c0_3 = arith.constant 0 : index
    %c0_4 = arith.constant 0 : index
    %2 = vector.load %arg3[%c0_2, %c0_3, %c0_4] : memref<1x3x256xf32, #tpu.memory_space<vmem>>, vector<1x3x256xf32>
    %3 = vector.shape_cast %2 : vector<1x3x256xf32> to vector<3x256xf32>
    %4 = vector.extract_strided_slice %3 {offsets = [0, 0], sizes = [1, 256], strides = [1, 1]} : vector<3x256xf32> to vector<1x256xf32>
    %cst = arith.constant 1.000000e+00 : f32
    %5 = vector.broadcast %cst : f32 to vector<1x256xf32>
    %6 = arith.cmpf oeq, %4, %5 : vector<1x256xf32>
    %7 = vector.extract_strided_slice %3 {offsets = [1, 0], sizes = [1, 256], strides = [1, 1]} : vector<3x256xf32> to vector<1x256xf32>
    %cst_5 = arith.constant 5.000000e+00 : f32
    %8 = vector.broadcast %cst_5 : f32 to vector<1x256xf32>
    %9 = arith.select %6, %7, %8 : vector<1x256xi1>, vector<1x256xf32>
    %10 = vector.extract_strided_slice %3 {offsets = [2, 0], sizes = [1, 256], strides = [1, 1]} : vector<3x256xf32> to vector<1x256xf32>
    %cst_6 = arith.constant 5.000000e+00 : f32
    %11 = vector.broadcast %cst_6 : f32 to vector<1x256xf32>
    %12 = arith.select %6, %10, %11 : vector<1x256xi1>, vector<1x256xf32>
    %cst_7 = arith.constant 1.000000e+00 : f32
    %13 = vector.broadcast %cst_7 : f32 to vector<1x256xf32>
    %14 = arith.addf %9, %13 : vector<1x256xf32>
    %cst_8 = arith.constant 7.500000e+00 : f32
    %15 = vector.broadcast %cst_8 : f32 to vector<1x256xf32>
    %16 = arith.mulf %14, %15 : vector<1x256xf32>
    %cst_9 = arith.constant 1.000000e+00 : f32
    %17 = vector.broadcast %cst_9 : f32 to vector<1x256xf32>
    %18 = arith.addf %12, %17 : vector<1x256xf32>
    %cst_10 = arith.constant 7.500000e+00 : f32
    %19 = vector.broadcast %cst_10 : f32 to vector<1x256xf32>
    %20 = arith.mulf %18, %19 : vector<1x256xf32>
    %21 = tpu.iota {dimensions = array<i32: 0>} : vector<16x256xi32>
    %22 = arith.sitofp %21 : vector<16x256xi32> to vector<16x256xf32>
    %23 = tpu.iota {dimensions = array<i32: 0>} : vector<16x256xi32>
    %24 = arith.sitofp %23 : vector<16x256xi32> to vector<16x256xf32>
    %25 = vector.broadcast %16 : vector<1x256xf32> to vector<16x256xf32>
    %26 = arith.subf %25, %22 : vector<16x256xf32>
    %27 = math.absf %26 : vector<16x256xf32>
    %cst_11 = arith.constant 1.000000e+00 : f32
    %28 = vector.broadcast %cst_11 : f32 to vector<16x256xf32>
    %29 = arith.subf %28, %27 : vector<16x256xf32>
    %cst_12 = arith.constant 0.000000e+00 : f32
    %30 = vector.broadcast %cst_12 : f32 to vector<16x256xf32>
    %31 = arith.maximumf %30, %29 : vector<16x256xf32>
    %32 = vector.broadcast %20 : vector<1x256xf32> to vector<16x256xf32>
    %33 = arith.subf %32, %24 : vector<16x256xf32>
    %34 = math.absf %33 : vector<16x256xf32>
    %cst_13 = arith.constant 1.000000e+00 : f32
    %35 = vector.broadcast %cst_13 : f32 to vector<16x256xf32>
    %36 = arith.subf %35, %34 : vector<16x256xf32>
    %cst_14 = arith.constant 0.000000e+00 : f32
    %37 = vector.broadcast %cst_14 : f32 to vector<16x256xf32>
    %38 = arith.maximumf %37, %36 : vector<16x256xf32>
    %cst_15 = arith.constant dense<0.000000e+00> : vector<48x256xf32>
    %39 = tpu.matmul %1, %31, %cst_15 {dimension_numbers = #tpu.dot_dimension_numbers<[1], [0], [0], [1], [0, 0, 1, 1], [], []>} : vector<48x16xf32>, vector<16x256xf32>, vector<48x256xf32> -> vector<48x256xf32>
    %40 = vector.shape_cast %39 : vector<48x256xf32> to vector<3x16x256xf32>
    %41 = vector.shape_cast %38 : vector<16x256xf32> to vector<1x16x256xf32>
    %42 = vector.broadcast %41 : vector<1x16x256xf32> to vector<3x16x256xf32>
    %43 = arith.mulf %40, %42 : vector<3x16x256xf32>
    %cst_16 = arith.constant dense<0.000000e+00> : vector<3x256xf32>
    %44 = vector.multi_reduction <add>, %43, %cst_16 [1] : vector<3x16x256xf32> to vector<3x256xf32>
    %c0_17 = arith.constant 0 : index
    %c0_18 = arith.constant 0 : index
    %c0_19 = arith.constant 0 : index
    %45 = vector.load %arg4[%c0_17, %c0_18, %c0_19] : memref<1x3x256xf32, #tpu.memory_space<vmem>>, vector<1x3x256xf32>
    %46 = vector.shape_cast %45 : vector<1x3x256xf32> to vector<3x256xf32>
    %47 = vector.shape_cast %44 : vector<3x256xf32> to vector<1x3x256xf32>
    tpu.vector_store %arg4[%c0_17, %c0_18, %c0_19], %47 {strides = array<i32>} : memref<1x3x256xf32, #tpu.memory_space<vmem>>, vector<1x3x256xf32>,
    return
  }
  func.func @transform_0(%arg0: i32, %arg1: i32) -> (i32, i32, i32) {
    %c0_i32 = arith.constant 0 : i32
    %c0_i32_0 = arith.constant 0 : i32
    %c0_i32_1 = arith.constant 0 : i32
    return %arg0, %c0_i32, %c0_i32_0 : i32, i32, i32
  }
  func.func @transform_1(%arg0: i32, %arg1: i32) -> (i32, i32, i32) {
    %c0_i32 = arith.constant 0 : i32
    %c0_i32_0 = arith.constant 0 : i32
    return %arg0, %c0_i32, %arg1 : i32, i32, i32
  }
  func.func @transform_2(%arg0: i32, %arg1: i32) -> (i32, i32, i32) {
    %c0_i32 = arith.constant 0 : i32
    %c0_i32_0 = arith.constant 0 : i32
    return %arg0, %c0_i32, %arg1 : i32, i32, i32
  }
}

</mosaic_0001>

<bundles_post_ra>
// kernel: tpu_custom_call.1
= control target key start
LH: loop header
LB: loop body
LE: loop exit
PB: predicated region body
PF: predicated region fallthrough
CT: control target
= control target key end

     0   :  { %s685_s9 = smov 0   ;;  %s687_s10 = smov 0   ;;  %s747_s0 = inlined_call_operand.vmem [shape: f32[2,48,16], index: 0, kind: input, shape index: {}]   ;;  %s748_s1 = inlined_call_operand.vmem [shape: f32[2,3,256], index: 1, kind: input, shape index: {}]   ;;  %s749_s2 = inlined_call_operand.vmem [shape: f32[2,3,256], index: 2, kind: output, shape index: {}]  }
   0x1   :  { %s689_s11 = smov 0  }
   0x2 LB: > { %s24_s12 = sadd.s32 1, %s663_s10  ;;  %p597_p0 = scmp.ge.s32.totalorder %s667_s11, 1  ;;  %s667_s11 = sphi %s689_s11, %s12_s11   ;;  %s663_s10 = sphi %s687_s10, %s751_s10   ;;  %s659_s9 = sphi %s685_s9, %s750_s9  }
   0x3   : > { %p26_p1 = scmp.ge.s32.totalorder %s24_s12, 2  ;;  %p143_p2 = scmp.lt.s32.totalorder %s667_s11, 3 }
   0x5   : > { %s753_s12 = smov (%p26_p1, %s24_s12), 0  ;;  %p144_p3 = pnand %p597_p0, %p143_p2 }
   0x6   : > { %p178_p4 = scmp.lt.s32.totalorder (!%p144_p3), %s659_s9, 1 }
   0x7   : > { %147 = sbr.rel (%p144_p3) target bundleno = 268 (0x10c), region = 28 }
   0xc   : > { %v669_v0 = vmov 0.0   ;;  %s755_s9 = smov (!%p178_p4, %s659_s9), 1  ;;  %v224_v1 = vlaneseq  ;;  %vm299_vm1 = vcmask 130048   ;;  %vm483_vm2 = vcmask 1041409  }
   0xd   : > { %382 = vmatprep.mubr.f32.mxu0 %v669_v0  ;;  %400 = vmatprep.mubr.f32.mxu1 %v669_v0  ;;  %s613_s13 = sshll.u32 %s755_s9, 3  ;;  %s619_s17 = smul.u32 48, %s755_s9  ;;  %vm485_vm3 = vcmask 1045509   ;;  %vm488_vm4 = vcmask 1042434   ;;  %vm490_vm5 = vcmask 1046534  }
   0xe   : > { %s191_s16 = scalar_lea.vmem %s748_s1, %s613_s13  ;;  %v711_v3 = vshrl.u32 %v224_v1, 7  ;;  %s201_s23 = scalar_lea.vmem %s749_s2, %s613_s13 }
   0xf   : > { %v209_v2 = vld [vmem:[%s191_s16] sm:$0x77]  ;;  %s182_s20 = scalar_lea.vmem %s747_s0, %s619_s17 }
  0x10   : > { %vm210_vm0 = vcmp.eq.f32.partialorder %v209_v2, 1.0  ;;  %v603_v4 = vrot.slane %v209_v2, 9  ;;  %v604_v5 = vrot.slane %v209_v2, 10  ;;  %v226_v9 = vadd.s32 8, %v711_v3  ;;  %v203_v35 = vld [vmem:[%s182_s20] sm:$0xff]  ;;  %v206_v36 = vld [vmem:[%s182_s20 + $0x18] sm:$0xff] }
  0x11   : > { %v232_v10 = vsub.s32 0, %v711_v3  ;;  %v236_v11 = vsub.s32 4, %v711_v3  ;;  %v227_v16 = vcvt.s32.f32 %v711_v3  ;;  %v204_v37 = vld [vmem:[%s182_s20 + $0x8] sm:$0xff]  ;;  %v207_v38 = vld [vmem:[%s182_s20 + $0x20] sm:$0xff]  ;;  %v205_v39 = vld [vmem:[%s182_s20 + $0x10] sm:$0xff] }
  0x12   : > { %v215_v6 = vsel %vm210_vm0, %v603_v4, 5.0  ;;  %v219_v7 = vsel %vm210_vm0, %v604_v5, 5.0  ;;  %v716_v13 = vcvt.s32.f32 %v226_v9  ;;  %v208_v40 = vld [vmem:[%s182_s20 + $0x28] sm:$0xff] }
  0x13   : > { %v220_v8 = vadd.f32 1.0, %v215_v6  ;;  %v222_v41 = vadd.f32 1.0, %v219_v7 }
  0x15   : > { %v221_v12 = vmul.f32 7.5, %v220_v8  ;;  %v223_v42 = vmul.f32 7.5, %v222_v41 }
  0x17   : > { %v237_v14 = vrot.slane %v221_v12, %v236_v11  ;;  %v233_v15 = vrot.slane %v221_v12, %v232_v10  ;;  %v268_v43 = vrot.slane %v223_v42, %v232_v10  ;;  %v272_v44 = vrot.slane %v223_v42, %v236_v11 }
  0x19   : > { %v247_v17 = vrot.slane %v237_v14, %v232_v10  ;;  %v243_v18 = vrot.slane %v233_v15, %v232_v10  ;;  %v278_v45 = vrot.slane %v268_v43, %v232_v10  ;;  %v282_v46 = vrot.slane %v272_v44, %v232_v10 }
  0x1b   : > { %v251_v19 = vsub.f32 %v247_v17, %v716_v13  ;;  %v250_v20 = vsub.f32 %v243_v18, %v716_v13  ;;  %v249_v21 = vsub.f32 %v247_v17, %v227_v16  ;;  %v248_v22 = vsub.f32 %v243_v18, %v227_v16 }
  0x1c   : > { %v283_v47 = vsub.f32 %v278_v45, %v227_v16  ;;  %v285_v48 = vsub.f32 %v278_v45, %v716_v13  ;;  %v284_v49 = vsub.f32 %v282_v46, %v227_v16  ;;  %v286_v51 = vsub.f32 %v282_v46, %v716_v13 }
  0x1d   : > { %v255_v23 = vand.u32 2147483647, %v251_v19  ;;  %v254_v24 = vand.u32 2147483647, %v250_v20  ;;  %v253_v25 = vand.u32 2147483647, %v249_v21 }
  0x1e   : > { %v252_v26 = vand.u32 2147483647, %v248_v22  ;;  %v287_v50 = vand.u32 2147483647, %v283_v47  ;;  %v289_v52 = vand.u32 2147483647, %v285_v48 }
  0x1f   : > { %v259_v27 = vsub.f32 1.0, %v255_v23  ;;  %v258_v28 = vsub.f32 1.0, %v254_v24  ;;  %v257_v29 = vsub.f32 1.0, %v253_v25  ;;  %v288_v53 = vand.u32 2147483647, %v284_v49 }
  0x20   : > { %v256_v30 = vsub.f32 1.0, %v252_v26  ;;  %v291_v54 = vsub.f32 1.0, %v287_v50  ;;  %v290_v55 = vand.u32 2147483647, %v286_v51  ;;  %v293_v56 = vsub.f32 1.0, %v289_v52 }
  0x21   : > { %v263_v31 = vmax.f32 %v259_v27, 0.0  ;;  %v262_v32 = vmax.f32 %v258_v28, 0.0  ;;  %v261_v33 = vmax.f32 %v257_v29, 0.0  ;;  %v292_v57 = vsub.f32 1.0, %v288_v53 }
  0x22   : > { %v260_v34 = vmax.f32 %v256_v30, 0.0  ;;  %v295_v60 = vmax.f32 %v291_v54, 0.0  ;;  %v294_v61 = vsub.f32 1.0, %v290_v55 }
  0x23   : > { %346 = vmatprep.subr.mxu0 %v263_v31  ;;  %615 = vmatprep.subr.mxu1 %v263_v31  ;;  %v296_v1 = vmax.f32 %v292_v57, 0.0 }
  0x24   : > { %347 = vmatpush1.msra.mxu0 %v262_v32  ;;  %617 = vmatpush1.msra.mxu1 %v262_v32  ;;  %v298_v5 = vmax.f32 %v294_v61, 0.0 }
  0x25   : > { %348 = vmatprep.subr.mxu0 %v261_v33  ;;  %616 = vmatprep.subr.mxu1 %v261_v33 }
  0x26   : > { %349 = vmatpush1.msra.mxu0 %v260_v34  ;;  %618 = vmatpush1.msra.mxu1 %v260_v34 }
  0x27   : > { %605 = vmatmul.mubr.msk.f32.vlgmr.msra.gmra.mxu0 %vm299_vm1, %v203_v35  ;;  %608 = vmatmul.mubr.msk.f32.vlgmr.msra.gmra.mxu1 %vm299_vm1, %v206_v36 }
  0x28   : > { %388 = vmatprep.mubr.f32.mxu0 %v669_v0  ;;  %406 = vmatprep.mubr.f32.mxu1 %v669_v0 }
  0x2b   : > { %606 = vmatmul.mubr.msk.f32.gmra.mxu0 %vm299_vm1, %v204_v37  ;;  %609 = vmatmul.mubr.msk.f32.gmra.mxu1 %vm299_vm1, %v207_v38 }
  0x2c   : > { %394 = vmatprep.mubr.f32.mxu0 %v669_v0  ;;  %412 = vmatprep.mubr.f32.mxu1 %v669_v0  ;;  %v297_v0 = vmax.f32 %v293_v56, 0.0 }
  0x2f   : > { %607 = vmatmul.mubr.msk.f32.gmra.mxu0 %vm299_vm1, %v205_v39  ;;  %610 = vmatmul.mubr.msk.f32.gmra.mxu1 %vm299_vm1, %v208_v40 }
  0xe7   : > { %v384_v58 = vpop.f32.mrf.mxu0  ;;  %v402_v59 = vpop.f32.mrf.mxu1 }
  0xe8   : > { %v419_v4 = vmul.f32 %v384_v58, %v295_v60  ;;  %v425_v12 = vmul.f32 %v402_v59, %v297_v0 }
  0xe9   : > { %v386_v62 = vpop.f32.mrf.mxu0  ;;  %v404_v63 = vpop.f32.mrf.mxu1 }
  0xea   : > { %v420_v9 = vmul.f32 %v386_v62, %v296_v1  ;;  %v426_v22 = vmul.f32 %v404_v63, %v298_v5 }
  0xeb   : > { %v390_v2 = vpop.f32.mrf.mxu0  ;;  %v408_v3 = vpop.f32.mrf.mxu1 }
  0xec   : > { %v421_v6 = vmul.f32 %v390_v2, %v297_v0  ;;  %v427_v13 = vmul.f32 %v408_v3, %v295_v60 }
  0xed   : > { %v392_v7 = vpop.f32.mrf.mxu0  ;;  %v410_v8 = vpop.f32.mrf.mxu1 }
  0xee   : > { %v431_v10 = vadd.f32 %v421_v6, %v419_v4  ;;  %v422_v11 = vmul.f32 %v392_v7, %v298_v5  ;;  %v428_v27 = vmul.f32 %v410_v8, %v296_v1 }
  0xef   : > { %v396_v14 = vpop.f32.mrf.mxu0  ;;  %v414_v15 = vpop.f32.mrf.mxu1 }
  0xf0   : > { %v432_v16 = vrot.slane %v431_v10, 4  ;;  %v438_v17 = vadd.f32 %v422_v11, %v420_v9  ;;  %v423_v18 = vmul.f32 %v396_v14, %v295_v60  ;;  %v429_v19 = vmul.f32 %v414_v15, %v297_v0 }
  0xf1   : > { %v398_v20 = vpop.f32.mrf.mxu0  ;;  %v416_v21 = vpop.f32.mrf.mxu1 }
  0xf2   : > { %v439_v23 = vrot.slane %v438_v17, 4  ;;  %v445_v24 = vadd.f32 %v425_v12, %v423_v18  ;;  %v459_v25 = vadd.f32 %v429_v19, %v427_v13  ;;  %v433_v26 = vadd.f32 %v432_v16, %v431_v10 }
  0xf3   : > { %v424_v28 = vmul.f32 %v398_v20, %v296_v1  ;;  %v430_v29 = vmul.f32 %v416_v21, %v298_v5 }
  0xf4   : > { %v440_v30 = vadd.f32 %v439_v23, %v438_v17  ;;  %v446_v31 = vrot.slane %v445_v24, 4  ;;  %v460_v32 = vrot.slane %v459_v25, 4  ;;  %v434_v38 = vrot.slane %v433_v26, 2 }
  0xf5   : > { %v452_v33 = vadd.f32 %v426_v22, %v424_v28  ;;  %v466_v34 = vadd.f32 %v430_v29, %v428_v27 }
  0xf6   : > { %v441_v35 = vrot.slane %v440_v30, 2  ;;  %v447_v36 = vadd.f32 %v446_v31, %v445_v24  ;;  %v461_v37 = vadd.f32 %v460_v32, %v459_v25  ;;  %v435_v48 = vadd.f32 %v434_v38, %v433_v26 }
  0xf7   : > { %v453_v39 = vrot.slane %v452_v33, 4  ;;  %v467_v40 = vrot.slane %v466_v34, 4 }
  0xf8   : > { %v442_v41 = vadd.f32 %v441_v35, %v440_v30  ;;  %v448_v42 = vrot.slane %v447_v36, 2  ;;  %v462_v43 = vrot.slane %v461_v37, 2  ;;  %v436_v56 = vrot.slane %v435_v48, 1 }
  0xf9   : > { %v454_v44 = vadd.f32 %v453_v39, %v452_v33  ;;  %v468_v45 = vadd.f32 %v467_v40, %v466_v34 }
  0xfa   : > { %v449_v46 = vadd.f32 %v448_v42, %v447_v36  ;;  %v463_v47 = vadd.f32 %v462_v43, %v461_v37  ;;  %v443_v51 = vrot.slane %v442_v41, 1  ;;  %v437_v0 = vadd.f32 %v436_v56, %v435_v48 }
  0xfb   : > { %v455_v49 = vrot.slane %v454_v44, 2  ;;  %v469_v50 = vrot.slane %v468_v45, 2 }
  0xfc   : > { %v450_v52 = vrot.slane %v449_v46, 1  ;;  %v464_v53 = vrot.slane %v463_v47, 1  ;;  %v444_v59 = vadd.f32 %v443_v51, %v442_v41 }
  0xfd   : > { %v456_v54 = vadd.f32 %v455_v49, %v454_v44  ;;  %v470_v55 = vadd.f32 %v469_v50, %v468_v45 }
  0xfe   : > { %v451_v60 = vadd.f32 %v450_v52, %v449_v46  ;;  %v465_v61 = vadd.f32 %v464_v53, %v463_v47  ;;  %v479_v3 = vcombine.low %v437_v0, %v444_v59 }
  0xff   : > { %v457_v57 = vrot.slane %v456_v54, 1  ;;  %v471_v58 = vrot.slane %v470_v55, 1 }
 0x101   : > { %v458_v62 = vadd.f32 %v457_v57, %v456_v54  ;;  %v472_v63 = vadd.f32 %v471_v58, %v470_v55 }
 0x103   : > { %v480_v1 = vcombine.low %v451_v60, %v458_v62  ;;  %v481_v2 = vcombine.low %v465_v61, %v472_v63 }
 0x105   : > { %v482_v4 = vrot.slane %v480_v1, 7  ;;  %v487_v6 = vrot.slane %v481_v2, 6 }
 0x107   : > { %v484_v5 = vsel %vm483_vm2, %v482_v4, %v479_v3 }
 0x108   : > { %v486_v7 = vsel %vm485_vm3, %v482_v4, %v484_v5 }
 0x109   : > { %v489_v8 = vsel %vm488_vm4, %v487_v6, %v486_v7 }
 0x10a   : > { %v491_v9 = vsel %vm490_vm5, %v487_v6, %v489_v8 }
 0x10b   : > { %493 = vst [vmem:[%s201_s23] sm:$0x77] %v491_v9 }
 0x10c PF: > { %s12_s11 = sadd.s32 1, %s667_s11   ;;  %s750_s9 = smov %s663_s10 }
 0x10d   : > { %p9_p5 = scmp.ge.s32.totalorder %s12_s11, 4   ;;  %s751_s10 = smov %s753_s12 }
 0x10f   :  { %11 = sbr.rel (!%p9_p5) target bundleno = 2 (0x2), region = 61 }

</bundles_post_ra>
